<compile_context>
chip_gen: v5e
topology: v5e:2x2
jax: 0.10.0
libtpu: 0.0.40
codegen_flags: <defaults>
</compile_context>

<pallas_src>
import functools

import jax
import jax.numpy as jnp
from jax.experimental import pallas as pl
from jax.experimental.pallas import tpu as pltpu

EPS = 1e-5                 # nn.BatchNorm2d default eps
SOFTPLUS_THRESHOLD = 20.0  # torch.nn.Softplus default threshold


# ------------------------------ fused kernel ------------------------------- #

def _make_fused_kernel(B, C, HW, group_ks, group_hwos, group_scales,
                       u_offsets, weight_y1):
    """One fused kernel: conv matmuls + bilinear-upsample matmuls + weighted
    sum + Softplus + (BN1∘BN2 fused analytically).  Group g's conv weights sit
    in rows [g*C,(g+1)*C) of the packed weight tile; its bias is column g of
    the packed scalar tile; its upsample operator (if scale>1) sits at row
    offset u_offsets[g] of the packed U tile."""
    n_groups = len(group_ks)
    has_u = any(s != 1 for s in group_scales)
    inv_n = 1.0 / float(B * HW)

    def kernel(*refs):
        b_ref = refs[0]                              # (C, B*HW) f32
        p_refs = refs[1:1 + n_groups]                # (K_g, B*HoWo_g) bf16
        w_ref = refs[1 + n_groups]                   # (G*C, Kmax) bf16
        pos = 2 + n_groups
        u_ref = None
        if has_u:
            u_ref = refs[pos]                        # (sum rows, B*HW) bf16
            pos += 1
        s_ref = refs[pos]                            # (C, G+4) f32
        o_ref = refs[pos + 1]                        # (C, B*HW) f32

        s = s_ref[...]                               # biases + BN params

        # Accumulate z = weight_y1*b + sum_g upsample(conv_g) + bias_g, all in
        # (C, B*HW) f32.  weight_x_i is pre-folded into the weight tile.
        z = weight_y1 * b_ref[...]
        for g in range(n_groups):
            kg = group_ks[g]
            wg = w_ref[g * C:(g + 1) * C, 0:kg]                      # bf16
            y = jnp.dot(wg, p_refs[g][...],
                        preferred_element_type=jnp.float32)          # (C, B*HoWo)
            if group_scales[g] != 1:
                rows = B * group_hwos[g]
                off = u_offsets[g]
                ug = u_ref[off:off + rows, :]                        # bf16
                # block-diag (over batch) bilinear interpolation on the MXU
                y = jnp.dot(y.astype(jnp.bfloat16), ug,
                            preferred_element_type=jnp.float32)      # (C, B*HW)
            # interpolation weights per output pixel sum to 1, so the per-group
            # bias can be added after the upsample
            z = z + y + s[:, g:g + 1]

        # torch.nn.Softplus(beta=1, threshold=20), numerically stable form.
        u_abs = jnp.exp(-jnp.abs(z))
        log1p_u = jnp.where(u_abs > 1e-4, jnp.log(1.0 + u_abs),
                            u_abs * (1.0 - 0.5 * u_abs))
        sp = jnp.where(z > SOFTPLUS_THRESHOLD,
                       z, jnp.maximum(z, 0.0) + log1p_u)

        # BN1 followed by BN2 (both training-mode, biased batch stats over
        # (B,H,W) = the lane axis), fused analytically:
        #   mean(y1) = beta1 exactly, var(y1) = gamma1^2 * var1/(var1+eps)
        # => y2 = sp*scale + shift with one combined per-channel scale/shift.
        g1 = s[:, n_groups + 0:n_groups + 1]
        b1 = s[:, n_groups + 1:n_groups + 2]   # noqa: F841 (absorbed exactly)
        g2 = s[:, n_groups + 2:n_groups + 3]
        b2 = s[:, n_groups + 3:n_groups + 4]

        mean1 = jnp.sum(sp, axis=1, keepdims=True) * inv_n           # (C, 1)
        d = sp - mean1
        var1 = jnp.sum(d * d, axis=1, keepdims=True) * inv_n         # (C, 1)
        inv1 = jax.lax.rsqrt(var1 + EPS)
        var_y1 = (g1 * g1) * var1 * (inv1 * inv1)
        scale = g1 * g2 * inv1 * jax.lax.rsqrt(var_y1 + EPS)
        shift = b2 - mean1 * scale

        o_ref[...] = sp * scale + shift                              # lane-dense

    return kernel


# ------------------------------ wrapper glue -------------------------------- #

def _interp_matrix(out_size, in_size, scale):
    """1D bilinear interpolation matrix (out, in), align_corners=False."""
    o = jnp.arange(out_size, dtype=jnp.float32)
    src = jnp.clip((o + 0.5) / float(scale) - 0.5, 0.0, in_size - 1)
    lo = jnp.floor(src).astype(jnp.int32)
    hi = jnp.minimum(lo + 1, in_size - 1)
    f = src - lo.astype(jnp.float32)
    return (jax.nn.one_hot(lo, in_size, dtype=jnp.float32) * (1.0 - f)[:, None]
            + jax.nn.one_hot(hi, in_size, dtype=jnp.float32) * f[:, None])


def _upsample_matrix(h_in, w_in, h_out, w_out, scale):
    """(h_in*w_in, h_out*w_out) operator: conv_flat @ U == bilinear upsample."""
    ay = _interp_matrix(h_out, h_in, scale)              # (h_out, h_in)
    ax = _interp_matrix(w_out, w_in, scale)              # (w_out, w_in)
    u = ay.T[:, None, :, None] * ax.T[None, :, None, :]  # (h_in, w_in, h_out, w_out)
    return u.reshape(h_in * w_in, h_out * w_out)


def _im2col_nchw(x):
    """x: (B,Cin,H,W) -> patches (B, 9*Cin, (H-2)*(W-2)); k = ci*9 + dy*3 + dx."""
    Bb, cin, H, W = x.shape
    ho, wo = H - 2, W - 2
    taps = [x[:, :, dy:dy + ho, dx:dx + wo] for dy in range(3) for dx in range(3)]
    return jnp.stack(taps, axis=2).reshape(Bb, cin * 9, ho * wo)


@functools.partial(jax.jit, static_argnums=(4, 5, 6))
def cnm_block_forward(params, gamma, xs, b, weight_y1, weight_xs, scales):
    """CNM_Block forward.  Tensor args are NCHW; output is NCHW float32."""
    B, C, H, W = b.shape
    HW = H * W

    # ---- group branches that share conv-output geometry and scale ----------
    group_of = {}
    groups, group_keys = [], []
    for i, (x, sc) in enumerate(zip(xs, scales)):
        ho, wo = x.shape[2] - 2, x.shape[3] - 2
        assert ho * int(sc) == H and wo * int(sc) == W
        key = (ho, wo, int(sc))
        if key not in group_of:
            group_of[key] = len(groups)
            groups.append([])
            group_keys.append(key)
        groups[group_of[key]].append(i)

    patches_g, w_blocks, biases = [], [], []
    ks, hwos, scs, u_mats = [], [], [], []
    for gi, members in enumerate(groups):
        ho, wo, sc = group_keys[gi]
        hwo = ho * wo
        # patches: (sum_members 9*Cin, B*HoWo), batch laid out along lanes
        p_cat = jnp.concatenate(
            [_im2col_nchw(xs[j]).transpose(1, 0, 2).reshape(-1, B * hwo)
             for j in members], axis=0)
        patches_g.append(p_cat.astype(jnp.bfloat16))
        # weights: scalar branch weight weight_x_j folded in, merged along K
        w_cat = jnp.concatenate(
            [params["convs"][j][0] * float(weight_xs[j]) for j in members],
            axis=1)                                            # (C, K_g)
        w_blocks.append(w_cat)
        bias_sum = params["convs"][members[0]][1]
        for j in members[1:]:
            bias_sum = bias_sum + params["convs"][j][1]
        biases.append(bias_sum)                                # (C, 1)
        ks.append(w_cat.shape[1]); hwos.append(hwo); scs.append(int(sc))
        if int(sc) != 1:
            u = _upsample_matrix(ho, wo, H, W, sc)             # (hwo, HW)
            u_mats.append(jnp.kron(jnp.eye(B, dtype=jnp.float32), u))
        else:
            u_mats.append(None)

    # ---- pack small operands to cut DMA count -------------------------------
    kmax = max(ks)
    w_pack = jnp.concatenate(
        [jnp.pad(wb, ((0, 0), (0, kmax - wb.shape[1]))) for wb in w_blocks],
        axis=0).astype(jnp.bfloat16)                           # (G*C, Kmax)

    u_offsets, u_list, off = [], [], 0
    for um in u_mats:
        if um is None:
            u_offsets.append(-1)
        else:
            u_offsets.append(off)
            u_list.append(um)
            off += um.shape[0]
    has_u = len(u_list) > 0
    u_pack = (jnp.concatenate(u_list, axis=0).astype(jnp.bfloat16)
              if has_u else None)                              # (sum rows, B*HW)

    scal_pack = jnp.concatenate(
        biases + [params["bn1_g"], params["bn1_b"],
                  params["bn2_g"], params["bn2_b"]], axis=1)   # (C, G+4) f32

    b2d = b.transpose(1, 0, 2, 3).reshape(C, B * HW)           # (C, B*HW) f32

    # gamma feeds only the (undefined) Con_solver branch.
    # TODO(synk): nmNet_head_link_d1d2_2 (Con_solver) and its in-forward Adam
    # test-time-adaptation branch (cfg.DUSE) are not defined in the reference
    # source; sigma2 is applied directly to the sigma output instead.
    del gamma

    kernel = _make_fused_kernel(B, C, HW, tuple(ks), tuple(hwos), tuple(scs),
                                tuple(u_offsets), float(weight_y1))

    vmem = pl.BlockSpec(memory_space=pltpu.MemorySpace.VMEM)
    operands = [b2d, *patches_g, w_pack] + ([u_pack] if has_u else []) + [scal_pack]
    out_flat = pl.pallas_call(
        kernel,
        out_shape=jax.ShapeDtypeStruct((C, B * HW), jnp.float32),
        in_specs=[vmem] * len(operands),
        out_specs=vmem,
    )(*operands)

    return out_flat.reshape(C, B, H, W).transpose(1, 0, 2, 3)


# -------------------------------- parameters -------------------------------- #

def init_cnm_block_params(key, in_chs, out_ch):
    """Synthetic params. Conv weights stored as (Cout, 9*Cin) (torch OIHW flattened)."""
    params = {"convs": []}
    for i, cin in enumerate(in_chs):
        kw, kb = jax.random.split(jax.random.fold_in(key, i))
        w = 0.1 * jax.random.normal(kw, (out_ch, cin, 3, 3), jnp.float32)
        bias = 0.1 * jax.random.normal(kb, (out_ch,), jnp.float32)
        params["convs"].append((w.reshape(out_ch, cin * 9), bias.reshape(out_ch, 1)))
    kg1, kb1, kg2, kb2 = jax.random.split(jax.random.fold_in(key, 100), 4)
    params["bn1_g"] = 1.0 + 0.1 * jax.random.normal(kg1, (out_ch, 1), jnp.float32)
    params["bn1_b"] = 0.1 * jax.random.normal(kb1, (out_ch, 1), jnp.float32)
    params["bn2_g"] = 1.0 + 0.1 * jax.random.normal(kg2, (out_ch, 1), jnp.float32)
    params["bn2_b"] = 0.1 * jax.random.normal(kb2, (out_ch, 1), jnp.float32)
    return params


# --------------------------- pure-JAX reference ----------------------------- #

def _softplus_ref(z):
    return jnp.where(z > SOFTPLUS_THRESHOLD, z,
                     jnp.maximum(z, 0.0) + jnp.log1p(jnp.exp(-jnp.abs(z))))


def _bn_ref(x, g, be):
    mean = jnp.mean(x, axis=(0, 2, 3), keepdims=True)
    var = jnp.mean((x - mean) ** 2, axis=(0, 2, 3), keepdims=True)
    return ((x - mean) * jax.lax.rsqrt(var + EPS) * g.reshape(1, -1, 1, 1)
            + be.reshape(1, -1, 1, 1))


def _conv3x3_ref(x, w_flat, bias):
    cout, cin9 = w_flat.shape
    w = w_flat.reshape(cout, cin9 // 9, 3, 3)
    y = jax.lax.conv_general_dilated(
        x, w, window_strides=(1, 1), padding="VALID",
        dimension_numbers=("NCHW", "OIHW", "NCHW"),
        precision=jax.lax.Precision.HIGHEST)
    return y + bias.reshape(1, cout, 1, 1)


def _upsample_bilinear_ref(x, scale):
    if scale == 1:
        return x
    Bb, C, h, w = x.shape
    H, W = h * scale, w * scale

    def coords(out_size, in_size, s):
        o = jnp.arange(out_size, dtype=jnp.float32)
        src = jnp.clip((o + 0.5) / s - 0.5, 0.0, in_size - 1)
        lo = jnp.floor(src).astype(jnp.int32)
        hi = jnp.minimum(lo + 1, in_size - 1)
        return lo, hi, src - lo.astype(jnp.float32)

    ylo, yhi, yf = coords(H, h, float(scale))
    xlo, xhi, xf = coords(W, w, float(scale))
    top, bot = x[:, :, ylo, :], x[:, :, yhi, :]
    tl, tr = top[:, :, :, xlo], top[:, :, :, xhi]
    bl, br = bot[:, :, :, xlo], bot[:, :, :, xhi]
    xf_b = xf.reshape(1, 1, 1, W)
    yf_b = yf.reshape(1, 1, H, 1)
    row_t = tl * (1.0 - xf_b) + tr * xf_b
    row_b = bl * (1.0 - xf_b) + br * xf_b
    return row_t * (1.0 - yf_b) + row_b * yf_b


def cnm_block_forward_ref(params, gamma, xs, b, weight_y1, weight_xs, scales):
    del gamma  # feeds only the undefined Con_solver branch
    z = weight_y1 * b
    for x, (w_flat, bias), wx, sc in zip(xs, params["convs"], weight_xs, scales):
        z = z + _upsample_bilinear_ref(_conv3x3_ref(wx * x, w_flat, bias), sc)
    y1 = _bn_ref(_softplus_ref(z), params["bn1_g"], params["bn1_b"])
    return _bn_ref(y1, params["bn2_g"], params["bn2_b"])


# ----------------------------------- main ----------------------------------- #

if __name__ == "__main__":
    key = jax.random.PRNGKey(0)
    k_gamma, k_b, k1, k2, k3, k4, k5, k_params = jax.random.split(key, 8)

    B, out_ch = 2, 8
    in_chs = (4, 4, 4, 4, 4)

    # Inputs (NCHW). Spatial sizes chosen so conv(3x3, pad=0) + bilinear upsample
    # by scale_i all land on the 16x16 grid of b.
    gamma = jax.random.normal(k_gamma, (1, out_ch, 16, 16), jnp.float32)
    b = jax.random.normal(k_b, (B, out_ch, 16, 16), jnp.float32)
    x1 = jax.random.normal(k1, (B, in_chs[0], 18, 18), jnp.float32)   # scale 1
    x2 = jax.random.normal(k2, (B, in_chs[1], 10, 10), jnp.float32)   # scale 2
    x3 = jax.random.normal(k3, (B, in_chs[2], 6, 6), jnp.float32)     # scale 4
    x4 = jax.random.normal(k4, (B, in_chs[3], 18, 18), jnp.float32)   # scale 1
    x5 = jax.random.normal(k5, (B, in_chs[4], 10, 10), jnp.float32)   # scale 2

    weight_y1 = 0.7
    weight_xs = (1.0, 0.5, 0.25, 0.8, 1.5)
    scales = (1, 2, 4, 1, 2)

    params = init_cnm_block_params(k_params, in_chs, out_ch)
    xs = (x1, x2, x3, x4, x5)

    out = cnm_block_forward(params, gamma, xs, b, weight_y1, weight_xs, scales)
    out = jax.block_until_ready(out)
    assert out.shape == (B, out_ch, 16, 16), out.shape
    assert bool(jnp.all(jnp.isfinite(out)))

    # Reference runs the convs at HIGHEST precision (true f32 baseline); the
    # kernel feeds the MXU bf16 inputs with f32 accumulation, so deviations of
    # O(1e-2) after the BatchNorm rescale are expected.
    ref = cnm_block_forward_ref(params, gamma, xs, b, weight_y1, weight_xs, scales)
    max_err = float(jnp.max(jnp.abs(out - ref)))
    assert max_err < 5e-2, f"mismatch vs pure-JAX reference: max abs err {max_err}"

    print("KERNEL_OK")
</pallas_src>

<mosaic_0001>
module attributes {stable_mosaic.version = 11 : i64} {
  func.func @kernel(%arg0: memref<8x512xf32, #tpu.memory_space<vmem>>, %arg1: memref<72x512xbf16, #tpu.memory_space<vmem>>, %arg2: memref<72x128xbf16, #tpu.memory_space<vmem>>, %arg3: memref<36x32xbf16, #tpu.memory_space<vmem>>, %arg4: memref<24x72xbf16, #tpu.memory_space<vmem>>, %arg5: memref<160x512xbf16, #tpu.memory_space<vmem>>, %arg6: memref<8x7xf32, #tpu.memory_space<vmem>>, %arg7: memref<8x512xf32, #tpu.memory_space<vmem>>) attributes {dimension_semantics = [], scalar_prefetch = 0 : i64, scratch_operands = 0 : i64, tpu.core_type = #tpu.core_type<tc>} {
    %c0 = arith.constant 0 : index
    %c0_0 = arith.constant 0 : index
    %0 = vector.load %arg6[%c0, %c0_0] : memref<8x7xf32, #tpu.memory_space<vmem>>, vector<8x7xf32>
    %c0_1 = arith.constant 0 : index
    %c0_2 = arith.constant 0 : index
    %1 = vector.load %arg0[%c0_1, %c0_2] : memref<8x512xf32, #tpu.memory_space<vmem>>, vector<8x512xf32>
    %cst = arith.constant 0.699999988 : f32
    %2 = vector.broadcast %cst : f32 to vector<8x512xf32>
    %3 = arith.mulf %2, %1 : vector<8x512xf32>
    %c0_3 = arith.constant 0 : index
    %c0_4 = arith.constant 0 : index
    %4 = vector.load %arg4[%c0_3, %c0_4] : memref<24x72xbf16, #tpu.memory_space<vmem>>, vector<8x72xbf16>
    %c0_5 = arith.constant 0 : index
    %c0_6 = arith.constant 0 : index
    %5 = vector.load %arg1[%c0_5, %c0_6] : memref<72x512xbf16, #tpu.memory_space<vmem>>, vector<72x512xbf16>
    %cst_7 = arith.constant dense<0.000000e+00> : vector<8x512xf32>
    %6 = tpu.matmul %4, %5, %cst_7 {dimension_numbers = #tpu.dot_dimension_numbers<[1], [0], [0], [1], [0, 0, 1, 1], [], []>} : vector<8x72xbf16>, vector<72x512xbf16>, vector<8x512xf32> -> vector<8x512xf32>
    %7 = arith.addf %3, %6 : vector<8x512xf32>
    %8 = vector.extract_strided_slice %0 {offsets = [0, 0], sizes = [8, 1], strides = [1, 1]} : vector<8x7xf32> to vector<8x1xf32>
    %9 = vector.broadcast %8 : vector<8x1xf32> to vector<8x512xf32>
    %10 = arith.addf %7, %9 : vector<8x512xf32>
    %c8 = arith.constant 8 : index
    %c0_8 = arith.constant 0 : index
    %11 = vector.load %arg4[%c8, %c0_8] : memref<24x72xbf16, #tpu.memory_space<vmem>>, vector<8x72xbf16>
    %c0_9 = arith.constant 0 : index
    %c0_10 = arith.constant 0 : index
    %12 = vector.load %arg2[%c0_9, %c0_10] : memref<72x128xbf16, #tpu.memory_space<vmem>>, vector<72x128xbf16>
    %cst_11 = arith.constant dense<0.000000e+00> : vector<8x128xf32>
    %13 = tpu.matmul %11, %12, %cst_11 {dimension_numbers = #tpu.dot_dimension_numbers<[1], [0], [0], [1], [0, 0, 1, 1], [], []>} : vector<8x72xbf16>, vector<72x128xbf16>, vector<8x128xf32> -> vector<8x128xf32>
    %c0_12 = arith.constant 0 : index
    %c0_13 = arith.constant 0 : index
    %14 = vector.load %arg5[%c0_12, %c0_13] : memref<160x512xbf16, #tpu.memory_space<vmem>>, vector<128x512xbf16>
    %15 = arith.truncf %13 : vector<8x128xf32> to vector<8x128xbf16>
    %cst_14 = arith.constant dense<0.000000e+00> : vector<8x512xf32>
    %16 = tpu.matmul %15, %14, %cst_14 {dimension_numbers = #tpu.dot_dimension_numbers<[1], [0], [0], [1], [0, 0, 1, 1], [], []>} : vector<8x128xbf16>, vector<128x512xbf16>, vector<8x512xf32> -> vector<8x512xf32>
    %17 = arith.addf %10, %16 : vector<8x512xf32>
    %18 = vector.extract_strided_slice %0 {offsets = [0, 1], sizes = [8, 1], strides = [1, 1]} : vector<8x7xf32> to vector<8x1xf32>
    %19 = vector.broadcast %18 : vector<8x1xf32> to vector<8x512xf32>
    %20 = arith.addf %17, %19 : vector<8x512xf32>
    %c16 = arith.constant 16 : index
    %c0_15 = arith.constant 0 : index
    %21 = vector.load %arg4[%c16, %c0_15] : memref<24x72xbf16, #tpu.memory_space<vmem>>, vector<8x36xbf16>
    %c0_16 = arith.constant 0 : index
    %c0_17 = arith.constant 0 : index
    %22 = vector.load %arg3[%c0_16, %c0_17] : memref<36x32xbf16, #tpu.memory_space<vmem>>, vector<36x32xbf16>
    %cst_18 = arith.constant dense<0.000000e+00> : vector<8x32xf32>
    %23 = tpu.matmul %21, %22, %cst_18 {dimension_numbers = #tpu.dot_dimension_numbers<[1], [0], [0], [1], [0, 0, 1, 1], [], []>} : vector<8x36xbf16>, vector<36x32xbf16>, vector<8x32xf32> -> vector<8x32xf32>
    %c128 = arith.constant 128 : index
    %c0_19 = arith.constant 0 : index
    %24 = vector.load %arg5[%c128, %c0_19] : memref<160x512xbf16, #tpu.memory_space<vmem>>, vector<32x512xbf16>
    %25 = arith.truncf %23 : vector<8x32xf32> to vector<8x32xbf16>
    %cst_20 = arith.constant dense<0.000000e+00> : vector<8x512xf32>
    %26 = tpu.matmul %25, %24, %cst_20 {dimension_numbers = #tpu.dot_dimension_numbers<[1], [0], [0], [1], [0, 0, 1, 1], [], []>} : vector<8x32xbf16>, vector<32x512xbf16>, vector<8x512xf32> -> vector<8x512xf32>
    %27 = arith.addf %20, %26 : vector<8x512xf32>
    %28 = vector.extract_strided_slice %0 {offsets = [0, 2], sizes = [8, 1], strides = [1, 1]} : vector<8x7xf32> to vector<8x1xf32>
    %29 = vector.broadcast %28 : vector<8x1xf32> to vector<8x512xf32>
    %30 = arith.addf %27, %29 : vector<8x512xf32>
    %31 = math.absf %30 : vector<8x512xf32>
    %cst_21 = arith.constant 0.000000e+00 : f32
    %32 = vector.broadcast %cst_21 : f32 to vector<8x512xf32>
    %33 = arith.subf %32, %31 : vector<8x512xf32>
    %34 = math.exp %33 : vector<8x512xf32>
    %cst_22 = arith.constant 9.99999974E-5 : f32
    %35 = vector.broadcast %cst_22 : f32 to vector<8x512xf32>
    %36 = arith.cmpf ogt, %34, %35 : vector<8x512xf32>
    %cst_23 = arith.constant 1.000000e+00 : f32
    %37 = vector.broadcast %cst_23 : f32 to vector<8x512xf32>
    %38 = arith.addf %37, %34 : vector<8x512xf32>
    %39 = math.log %38 : vector<8x512xf32>
    %cst_24 = arith.constant 5.000000e-01 : f32
    %40 = vector.broadcast %cst_24 : f32 to vector<8x512xf32>
    %41 = arith.mulf %40, %34 : vector<8x512xf32>
    %cst_25 = arith.constant 1.000000e+00 : f32
    %42 = vector.broadcast %cst_25 : f32 to vector<8x512xf32>
    %43 = arith.subf %42, %41 : vector<8x512xf32>
    %44 = arith.mulf %34, %43 : vector<8x512xf32>
    %45 = arith.select %36, %39, %44 : vector<8x512xi1>, vector<8x512xf32>
    %cst_26 = arith.constant 2.000000e+01 : f32
    %46 = vector.broadcast %cst_26 : f32 to vector<8x512xf32>
    %47 = arith.cmpf ogt, %30, %46 : vector<8x512xf32>
    %cst_27 = arith.constant 0.000000e+00 : f32
    %48 = vector.broadcast %cst_27 : f32 to vector<8x512xf32>
    %49 = arith.maximumf %30, %48 : vector<8x512xf32>
    %50 = arith.addf %49, %45 : vector<8x512xf32>
    %51 = arith.select %47, %30, %50 : vector<8x512xi1>, vector<8x512xf32>
    %52 = vector.extract_strided_slice %0 {offsets = [0, 3], sizes = [8, 1], strides = [1, 1]} : vector<8x7xf32> to vector<8x1xf32>
    %53 = vector.extract_strided_slice %0 {offsets = [0, 5], sizes = [8, 1], strides = [1, 1]} : vector<8x7xf32> to vector<8x1xf32>
    %54 = vector.extract_strided_slice %0 {offsets = [0, 6], sizes = [8, 1], strides = [1, 1]} : vector<8x7xf32> to vector<8x1xf32>
    %cst_28 = arith.constant dense<0.000000e+00> : vector<8xf32>
    %55 = vector.multi_reduction <add>, %51, %cst_28 [1] : vector<8x512xf32> to vector<8xf32>
    %56 = vector.shape_cast %55 : vector<8xf32> to vector<8x1xf32>
    %cst_29 = arith.constant 0.001953125 : f32
    %57 = vector.broadcast %cst_29 : f32 to vector<8x1xf32>
    %58 = arith.mulf %56, %57 : vector<8x1xf32>
    %59 = vector.broadcast %58 : vector<8x1xf32> to vector<8x512xf32>
    %60 = arith.subf %51, %59 : vector<8x512xf32>
    %61 = arith.mulf %60, %60 : vector<8x512xf32>
    %cst_30 = arith.constant dense<0.000000e+00> : vector<8xf32>
    %62 = vector.multi_reduction <add>, %61, %cst_30 [1] : vector<8x512xf32> to vector<8xf32>
    %63 = vector.shape_cast %62 : vector<8xf32> to vector<8x1xf32>
    %cst_31 = arith.constant 0.001953125 : f32
    %64 = vector.broadcast %cst_31 : f32 to vector<8x1xf32>
    %65 = arith.mulf %63, %64 : vector<8x1xf32>
    %cst_32 = arith.constant 9.99999974E-6 : f32
    %66 = vector.broadcast %cst_32 : f32 to vector<8x1xf32>
    %67 = arith.addf %65, %66 : vector<8x1xf32>
    %68 = math.rsqrt %67 : vector<8x1xf32>
    %69 = arith.mulf %52, %52 : vector<8x1xf32>
    %70 = arith.mulf %69, %65 : vector<8x1xf32>
    %71 = arith.mulf %68, %68 : vector<8x1xf32>
    %72 = arith.mulf %70, %71 : vector<8x1xf32>
    %73 = arith.mulf %52, %53 : vector<8x1xf32>
    %74 = arith.mulf %73, %68 : vector<8x1xf32>
    %cst_33 = arith.constant 9.99999974E-6 : f32
    %75 = vector.broadcast %cst_33 : f32 to vector<8x1xf32>
    %76 = arith.addf %72, %75 : vector<8x1xf32>
    %77 = math.rsqrt %76 : vector<8x1xf32>
    %78 = arith.mulf %74, %77 : vector<8x1xf32>
    %79 = arith.mulf %58, %78 : vector<8x1xf32>
    %80 = arith.subf %54, %79 : vector<8x1xf32>
    %81 = vector.broadcast %78 : vector<8x1xf32> to vector<8x512xf32>
    %82 = arith.mulf %51, %81 : vector<8x512xf32>
    %83 = vector.broadcast %80 : vector<8x1xf32> to vector<8x512xf32>
    %84 = arith.addf %82, %83 : vector<8x512xf32>
    %c0_34 = arith.constant 0 : index
    %c0_35 = arith.constant 0 : index
    %85 = vector.load %arg7[%c0_34, %c0_35] : memref<8x512xf32, #tpu.memory_space<vmem>>, vector<8x512xf32>
    tpu.vector_store %arg7[%c0_34, %c0_35], %84 {strides = array<i32>} : memref<8x512xf32, #tpu.memory_space<vmem>>, vector<8x512xf32>,
    return
  }
}

</mosaic_0001>

<bundles_post_ra>
// kernel: cnm_block_forward.1
= control target key start
LH: loop header
LB: loop body
LE: loop exit
PB: predicated region body
PF: predicated region fallthrough
CT: control target
= control target key end

     0   :  { %vm149_vm0 = vcmask 1043456   ;;  %v1200_v5 = vmov 0   ;;  %vm145_vm1 = vcmask 588800   ;;  %vm565_vm2 = vcmask 1041408   ;;  %s1719_s1 = inlined_call_operand.vmem [shape: bf16[72,512], index: 1, kind: input, shape index: {}]   ;;  %s1720_s6 = inlined_call_operand.vmem [shape: f32[8,7], index: 6, kind: input, shape index: {}]   ;;  %s1721_s2 = inlined_call_operand.vmem [shape: bf16[72,128], index: 2, kind: input, shape index: {}]   ;;  %s1722_s4 = inlined_call_operand.vmem [shape: bf16[24,72], index: 4, kind: input, shape index: {}]   ;;  %s1723_s5 = inlined_call_operand.vmem [shape: bf16[160,512], index: 5, kind: input, shape index: {}]   ;;  %s1724_s3 = inlined_call_operand.vmem [shape: bf16[36,32], index: 3, kind: input, shape index: {}]   ;;  %s1725_s0 = inlined_call_operand.vmem [shape: f32[8,512], index: 0, kind: input, shape index: {}]   ;;  %s1726_s7 = inlined_call_operand.vmem [shape: f32[8,512], index: 7, kind: output, shape index: {}]  }
   0x1   :  { %v53_v0 = vld [vmem:[%s1719_s1 + $0x80] sm:$0xff]  ;;  %v1119_v4 = vld [vmem:[%s1719_s1 + $0x6c] sm:$0xf0]  ;;  %1174 = vset.pattern.permute.xlu0 %v1200_v5  ;;  %v54_v14 = vld [vmem:[%s1719_s1 + $0x88] sm:$0xff]  ;;  %vm561_vm3 = vcmask 293888   ;;  %vm631_vm4 = vcmask 261120  }
   0x2   :  { %v105_v1 = vunpack.c.l.b16 %v53_v0  ;;  %v897_v3 = vld [vmem:[%s1719_s1 + $0x60] sm:$0xf]  ;;  %v1115_v10 = vld [vmem:[%s1719_s1 + $0x4c] sm:$0xf0]  ;;  %v106_v13 = vunpack.c.h.b16 %v53_v0  ;;  %v107_v18 = vunpack.c.l.b16 %v54_v14  ;;  %v108_v19 = vunpack.c.h.b16 %v54_v14  ;;  %v1117_v21 = vld [vmem:[%s1719_s1 + $0x64] sm:$0xf] }
   0x3   :  { %v1259_v6 = vld [vmem:[%s1720_s6] sm:$0xff]  ;;  %v898_v8 = vor.u32 %v1119_v4, %v897_v3  ;;  %v1111_v16 = vld [vmem:[%s1719_s1 + $0x2c] sm:$0xf0]  ;;  %v899_v22 = vld [vmem:[%s1719_s1 + $0x70] sm:$0xf0] }
   0x4   :  { %v125_v2 = vpack.c.b16 %v105_v1, %v105_v1  ;;  %220 = vperm.xlu0 %1174, %v1259_v6   ;;  %v881_v9 = vld [vmem:[%s1719_s1 + $0x40] sm:$0xf]  ;;  %v126_v20 = vpack.c.b16 %v106_v13, %v106_v13  ;;  %v905_v23 = vld [vmem:[%s1719_s1 + $0x68] sm:$0xf]  ;;  %v127_v24 = vpack.c.b16 %v107_v18, %v107_v18  ;;  %v128_v25 = vpack.c.b16 %v108_v19, %v108_v19  ;;  %v1120_v26 = vld [vmem:[%s1719_s1 + $0x74] sm:$0xf0] }
   0x5   :  { %v236_v11 = vld [vmem:[%s1721_s2 + $0x20] sm:$0xf]  ;;  %v882_v12 = vor.u32 %v1115_v10, %v881_v9  ;;  %v1118_v27 = vld [vmem:[%s1719_s1 + $0x6c] sm:$0xf]  ;;  %v907_v28 = vld [vmem:[%s1719_s1 + $0x78] sm:$0xf0]  ;;  %v902_v36 = vor.u32 %v1117_v21, %v899_v22  ;;  %v906_v37 = vor.u32 %v1120_v26, %v905_v23 }
   0x6   :  { %v151_v7 = vsel %vm149_vm0, %v125_v2, 0  ;;  %v865_v15 = vld [vmem:[%s1719_s1 + $0x20] sm:$0xf]  ;;  %v254_v17 = vunpack.c.l.b16 %v236_v11  ;;  %v154_v30 = vsel %vm149_vm0, %v126_v20, 0  ;;  %v1107_v32 = vld [vmem:[%s1719_s1 + $0xc] sm:$0xf0]  ;;  %v910_v38 = vor.u32 %v1118_v27, %v907_v28 }
   0x7   :  { %165 = vmatpush.bf16.msra.mxu0 %v151_v7  ;;  %v866_v29 = vor.u32 %v1111_v16, %v865_v15  ;;  %v849_v31 = vld [vmem:[%s1719_s1] sm:$0xf]  ;;  %178 = vmatpush.bf16.msra.mxu1 %v154_v30  ;;  %v157_v34 = vsel %vm149_vm0, %v127_v24, 0  ;;  %v160_v35 = vsel %vm149_vm0, %v128_v25, 0  ;;  %v1113_v39 = vld [vmem:[%s1719_s1 + $0x44] sm:$0xf] }
   0x8   :  { %v259_v33 = vpack.c.b16 %v254_v17, %v254_v17  ;;  %191 = vmatpush.bf16.msra.mxu2 %v157_v34  ;;  %204 = vmatpush.bf16.msra.mxu3 %v160_v35  ;;  %v883_v40 = vld [vmem:[%s1719_s1 + $0x50] sm:$0xf0]  ;;  %v889_v41 = vld [vmem:[%s1719_s1 + $0x48] sm:$0xf]  ;;  %v1116_v42 = vld [vmem:[%s1719_s1 + $0x54] sm:$0xf0]  ;;  %v850_v45 = vor.u32 %v1107_v32, %v849_v31 }
   0x9   :  { %v1114_v43 = vld [vmem:[%s1719_s1 + $0x4c] sm:$0xf]  ;;  %v891_v44 = vld [vmem:[%s1719_s1 + $0x58] sm:$0xf0]  ;;  %v886_v47 = vor.u32 %v1113_v39, %v883_v40  ;;  %v890_v48 = vor.u32 %v1116_v42, %v889_v41  ;;  %v1109_v50 = vld [vmem:[%s1719_s1 + $0x24] sm:$0xf] }
   0xa   :  { %v268_v46 = vsel %vm149_vm0, %v259_v33, 0  ;;  %v894_v49 = vor.u32 %v1114_v43, %v891_v44  ;;  %v867_v51 = vld [vmem:[%s1719_s1 + $0x30] sm:$0xf0]  ;;  %v873_v52 = vld [vmem:[%s1719_s1 + $0x28] sm:$0xf]  ;;  %v1124_v57 = vld [vmem:[%s1721_s2 + $0x18] sm:$0xff] }
   0xb   :  { %166 = vmatpush.bf16.msra.mxu0 %v898_v8  ;;  %179 = vmatpush.bf16.msra.mxu1 %v902_v36  ;;  %v1112_v53 = vld [vmem:[%s1719_s1 + $0x34] sm:$0xf0]  ;;  %v1110_v54 = vld [vmem:[%s1719_s1 + $0x2c] sm:$0xf]  ;;  %v875_v55 = vld [vmem:[%s1719_s1 + $0x38] sm:$0xf0]  ;;  %v870_v58 = vor.u32 %v1109_v50, %v867_v51 }
   0xc   :  { %192 = vmatpush.bf16.msra.mxu2 %v906_v37  ;;  %205 = vmatpush.bf16.msra.mxu3 %v910_v38  ;;  %v1348_v56 = vld [vmem:[%s1722_s4] sm:$0xf]  ;;  %v1105_v59 = vld [vmem:[%s1719_s1 + $0x4] sm:$0xf]  ;;  %v874_v60 = vor.u32 %v1112_v53, %v873_v52  ;;  %v878_v61 = vor.u32 %v1110_v54, %v875_v55  ;;  %v851_v62 = vld [vmem:[%s1719_s1 + $0x10] sm:$0xf0] }
   0xd   :  { %v857_v63 = vld [vmem:[%s1719_s1 + $0x8] sm:$0xf]  ;;  %v1108_v0 = vld [vmem:[%s1719_s1 + $0x14] sm:$0xf0]  ;;  %v1106_v1 = vld [vmem:[%s1719_s1 + $0xc] sm:$0xf]  ;;  %v854_v9 = vor.u32 %v1105_v59, %v851_v62 }
   0xe   :  { %v859_v2 = vld [vmem:[%s1719_s1 + $0x18] sm:$0xf0]  ;;  %v1046_v3 = vld [vmem:[%s1723_s5 + $0xe0] sm:$0xf]  ;;  %v1155_v4 = vld [vmem:[%s1723_s5 + $0xec] sm:$0xf0] }
   0xf   :  { %167 = vmatpush.bf16.msra.mxu0 %v882_v12  ;;  %180 = vmatpush.bf16.msra.mxu1 %v886_v47  ;;  %v1153_v5 = vld [vmem:[%s1723_s5 + $0xe4] sm:$0xf]  ;;  %v1048_v7 = vld [vmem:[%s1723_s5 + $0xf0] sm:$0xf0]  ;;  %v1054_v10 = vld [vmem:[%s1723_s5 + $0xe8] sm:$0xf]  ;;  %v858_v12 = vor.u32 %v1108_v0, %v857_v63  ;;  %v862_v13 = vor.u32 %v1106_v1, %v859_v2  ;;  %v1047_v14 = vor.u32 %v1155_v4, %v1046_v3 }
  0x10   :  { %193 = vmatpush.bf16.msra.mxu2 %v890_v48  ;;  %206 = vmatpush.bf16.msra.mxu3 %v894_v49  ;;  %v1123_v8 = vld [vmem:[%s1721_s2 + $0x10] sm:$0xff]  ;;  %v1156_v11 = vld [vmem:[%s1723_s5 + $0xf4] sm:$0xf0]  ;;  %v1051_v15 = vor.u32 %v1153_v5, %v1048_v7  ;;  %v1030_v16 = vld [vmem:[%s1723_s5 + $0xc0] sm:$0xf] }
  0x11   :  { %v1055_v17 = vor.u32 %v1156_v11, %v1054_v10  ;;  %v1151_v18 = vld [vmem:[%s1723_s5 + $0xcc] sm:$0xf0]  ;;  %v1149_v19 = vld [vmem:[%s1723_s5 + $0xc4] sm:$0xf]  ;;  %v1032_v20 = vld [vmem:[%s1723_s5 + $0xd0] sm:$0xf0] }
  0x12   :  { %v1122_v21 = vld [vmem:[%s1721_s2 + $0x8] sm:$0xff]  ;;  %v1152_v23 = vld [vmem:[%s1723_s5 + $0xd4] sm:$0xf0]  ;;  %v1056_v25 = vld [vmem:[%s1723_s5 + $0xf8] sm:$0xf0]  ;;  %v1031_v26 = vor.u32 %v1151_v18, %v1030_v16  ;;  %v1035_v27 = vor.u32 %v1149_v19, %v1032_v20 }
  0x13   :  { %168 = vmatpush.bf16.msra.mxu0 %v866_v29  ;;  %181 = vmatpush.bf16.msra.mxu1 %v870_v58  ;;  %v1038_v22 = vld [vmem:[%s1723_s5 + $0xc8] sm:$0xf]  ;;  %v1154_v24 = vld [vmem:[%s1723_s5 + $0xec] sm:$0xf]  ;;  %v1014_v28 = vld [vmem:[%s1723_s5 + $0xa0] sm:$0xf] }
  0x14   :  { %194 = vmatpush.bf16.msra.mxu2 %v874_v60  ;;  %207 = vmatpush.bf16.msra.mxu3 %v878_v61  ;;  %v1039_v29 = vor.u32 %v1152_v23, %v1038_v22  ;;  %v1147_v30 = vld [vmem:[%s1723_s5 + $0xac] sm:$0xf0]  ;;  %v1145_v31 = vld [vmem:[%s1723_s5 + $0xa4] sm:$0xf]  ;;  %v1016_v32 = vld [vmem:[%s1723_s5 + $0xb0] sm:$0xf0]  ;;  %v1059_v36 = vor.u32 %v1154_v24, %v1056_v25 }
  0x15   :  { %v1121_v33 = vld [vmem:[%s1721_s2] sm:$0xff]  ;;  %v1022_v34 = vld [vmem:[%s1723_s5 + $0xa8] sm:$0xf]  ;;  %v1148_v35 = vld [vmem:[%s1723_s5 + $0xb4] sm:$0xf0]  ;;  %v1015_v39 = vor.u32 %v1147_v30, %v1014_v28  ;;  %v1019_v40 = vor.u32 %v1145_v31, %v1016_v32 }
  0x16   :  { %v1150_v37 = vld [vmem:[%s1723_s5 + $0xcc] sm:$0xf]  ;;  %v1040_v38 = vld [vmem:[%s1723_s5 + $0xd8] sm:$0xf0]  ;;  %v1023_v41 = vor.u32 %v1148_v35, %v1022_v34  ;;  %v227_v42 = vld [vmem:[%s1722_s4 + $0x4] sm:$0xf] }
  0x17   :  { %169 = vmatpush.bf16.msra.mxu0 %v850_v45  ;;  %182 = vmatpush.bf16.msra.mxu1 %v854_v9  ;;  %v1043_v43 = vor.u32 %v1150_v37, %v1040_v38  ;;  %v1146_v44 = vld [vmem:[%s1723_s5 + $0xac] sm:$0xf]  ;;  %v1024_v45 = vld [vmem:[%s1723_s5 + $0xb8] sm:$0xf0]  ;;  %v998_v47 = vld [vmem:[%s1723_s5 + $0x80] sm:$0xf] }
  0x18   :  { %195 = vmatpush.bf16.msra.mxu2 %v858_v12  ;;  %208 = vmatpush.bf16.msra.mxu3 %v862_v13  ;;  %v1143_v48 = vld [vmem:[%s1723_s5 + $0x8c] sm:$0xf0]  ;;  %v1141_v49 = vld [vmem:[%s1723_s5 + $0x84] sm:$0xf]  ;;  %v1000_v51 = vld [vmem:[%s1723_s5 + $0x90] sm:$0xf0] }
  0x19   :  { %v999_v50 = vor.u32 %v1143_v48, %v998_v47  ;;  %v1006_v52 = vld [vmem:[%s1723_s5 + $0x88] sm:$0xf]  ;;  %v1144_v53 = vld [vmem:[%s1723_s5 + $0x94] sm:$0xf0]  ;;  %v1003_v54 = vor.u32 %v1141_v49, %v1000_v51  ;;  %v982_v59 = vld [vmem:[%s1723_s5 + $0x60] sm:$0xf] }
  0x1a   :  { %911 = vmatmul.msk.bf16.vlgmr.msra.gmra.mxu0 %vm145_vm1, %v1348_v56  ;;  %912 = vmatmul.msk.bf16.vlgmr.msra.gmra.mxu1 %vm145_vm1, %v1348_v56  ;;  %v1007_v55 = vor.u32 %v1144_v53, %v1006_v52  ;;  %v1139_v60 = vld [vmem:[%s1723_s5 + $0x6c] sm:$0xf0]  ;;  %v1137_v61 = vld [vmem:[%s1723_s5 + $0x64] sm:$0xf]  ;;  %v984_v63 = vld [vmem:[%s1723_s5 + $0x70] sm:$0xf0] }
  0x1b   :  { %273 = vmatpush.bf16.msrb.mxu0 %v268_v46  ;;  %476 = vmatpush.bf16.msrb.mxu1 %v1047_v14  ;;  %v1027_v46 = vor.u32 %v1146_v44, %v1024_v45  ;;  %v983_v62 = vor.u32 %v1139_v60, %v982_v59  ;;  %v990_v0 = vld [vmem:[%s1723_s5 + $0x68] sm:$0xf]  ;;  %v1140_v1 = vld [vmem:[%s1723_s5 + $0x74] sm:$0xf0]  ;;  %v987_v2 = vor.u32 %v1137_v61, %v984_v63  ;;  %v1138_v4 = vld [vmem:[%s1723_s5 + $0x6c] sm:$0xf] }
  0x1c   :  { %489 = vmatpush.bf16.msrb.mxu2 %v1051_v15  ;;  %502 = vmatpush.bf16.msrb.mxu3 %v1055_v17  ;;  %v991_v3 = vor.u32 %v1140_v1, %v990_v0  ;;  %v992_v5 = vld [vmem:[%s1723_s5 + $0x78] sm:$0xf0]  ;;  %v1135_v9 = vld [vmem:[%s1723_s5 + $0x4c] sm:$0xf0]  ;;  %v1133_v10 = vld [vmem:[%s1723_s5 + $0x44] sm:$0xf] }
  0x1d   :  { %913 = vmatmul.msk.bf16.vlgmr.msra.gmra.mxu2 %vm145_vm1, %v1348_v56  ;;  %914 = vmatmul.msk.bf16.vlgmr.msra.gmra.mxu3 %vm145_vm1, %v1348_v56  ;;  %v1142_v56 = vld [vmem:[%s1723_s5 + $0x8c] sm:$0xf]  ;;  %v995_v7 = vor.u32 %v1138_v4, %v992_v5  ;;  %v968_v12 = vld [vmem:[%s1723_s5 + $0x50] sm:$0xf0]  ;;  %v974_v13 = vld [vmem:[%s1723_s5 + $0x48] sm:$0xf] }
  0x1e   :  { %v1136_v14 = vld [vmem:[%s1723_s5 + $0x54] sm:$0xf0]  ;;  %v971_v15 = vor.u32 %v1133_v10, %v968_v12  ;;  %v1134_v17 = vld [vmem:[%s1723_s5 + $0x4c] sm:$0xf]  ;;  %v976_v18 = vld [vmem:[%s1723_s5 + $0x58] sm:$0xf0] }
  0x1f   :  { %274 = vmatpush.bf16.msrb.mxu0 %v1124_v57  ;;  %477 = vmatpush.bf16.msrb.mxu1 %v1031_v26  ;;  %v1008_v57 = vld [vmem:[%s1723_s5 + $0x98] sm:$0xf0]  ;;  %v975_v16 = vor.u32 %v1136_v14, %v974_v13  ;;  %v950_v19 = vld [vmem:[%s1723_s5 + $0x20] sm:$0xf]  ;;  %v979_v20 = vor.u32 %v1134_v17, %v976_v18  ;;  %v1129_v22 = vld [vmem:[%s1723_s5 + $0x24] sm:$0xf] }
  0x20   :  { %490 = vmatpush.bf16.msrb.mxu2 %v1035_v27  ;;  %503 = vmatpush.bf16.msrb.mxu3 %v1039_v29  ;;  %v1011_v58 = vor.u32 %v1142_v56, %v1008_v57  ;;  %v952_v23 = vld [vmem:[%s1723_s5 + $0x30] sm:$0xf0]  ;;  %v958_v26 = vld [vmem:[%s1723_s5 + $0x28] sm:$0xf]  ;;  %v1132_v27 = vld [vmem:[%s1723_s5 + $0x34] sm:$0xf0] }
  0x21   :  { %v955_v25 = vor.u32 %v1129_v22, %v952_v23  ;;  %v1130_v28 = vld [vmem:[%s1723_s5 + $0x2c] sm:$0xf]  ;;  %v959_v29 = vor.u32 %v1132_v27, %v958_v26  ;;  %v960_v30 = vld [vmem:[%s1723_s5 + $0x38] sm:$0xf0]  ;;  %v934_v32 = vld [vmem:[%s1723_s5] sm:$0xf] }
  0x22   :  { %v963_v31 = vor.u32 %v1130_v28, %v960_v30  ;;  %v1125_v34 = vld [vmem:[%s1723_s5 + $0x4] sm:$0xf]  ;;  %v942_v37 = vld [vmem:[%s1723_s5 + $0x8] sm:$0xf]  ;;  %v1128_v38 = vld [vmem:[%s1723_s5 + $0x14] sm:$0xf0] }
  0x23   :  { %275 = vmatpush.bf16.msrb.mxu0 %v1123_v8  ;;  %478 = vmatpush.bf16.msrb.mxu1 %v1015_v39  ;;  %v966_v8 = vld [vmem:[%s1723_s5 + $0x40] sm:$0xf]  ;;  %v545_v44 = vld [vmem:[%s1724_s3 + $0x10] sm:$0x3]  ;;  %v1158_v48 = vld [vmem:[%s1724_s3 + $0x8] sm:$0xff]  ;;  %v1201_v49 = vmov 1  }
  0x24   :  { %491 = vmatpush.bf16.msrb.mxu2 %v1019_v40  ;;  %504 = vmatpush.bf16.msrb.mxu3 %v1023_v41  ;;  %v967_v11 = vor.u32 %v1135_v9, %v966_v8  ;;  %v943_v40 = vor.u32 %v1128_v38, %v942_v37  ;;  %v1126_v41 = vld [vmem:[%s1723_s5 + $0xc] sm:$0xf]  ;;  %v555_v45 = vunpack.c.l.b16 %v545_v44  ;;  %v1087_v63 = vld [vmem:[%s1723_s5 + $0x120] sm:$0xf]  ;;  %v1165_v0 = vld [vmem:[%s1723_s5 + $0x12c] sm:$0xf0] }
  0x25   :  { %1175 = vset.pattern.permute.xlu0 %v1201_v49  ;;  %v1088_v1 = vor.u32 %v1165_v0, %v1087_v63  ;;  %v1163_v4 = vld [vmem:[%s1723_s5 + $0x124] sm:$0xf]  ;;  %v1095_v8 = vld [vmem:[%s1723_s5 + $0x128] sm:$0xf]  ;;  %v1166_v9 = vld [vmem:[%s1723_s5 + $0x134] sm:$0xf0] }
  0x26   :  { %533 = vperm.xlu0 %1175, %v1259_v6   ;;  %v1159_v12 = vld [vmem:[%s1723_s5 + $0x104] sm:$0xf]  ;;  %v1073_v13 = vld [vmem:[%s1723_s5 + $0x110] sm:$0xf0]  ;;  %v1079_v14 = vld [vmem:[%s1723_s5 + $0x108] sm:$0xf] }
  0x27   :  { %276 = vmatpush.bf16.msrb.mxu0 %v1122_v21  ;;  %479 = vmatpush.bf16.msrb.mxu1 %v999_v50  ;;  %v1131_v21 = vld [vmem:[%s1723_s5 + $0x2c] sm:$0xf0]  ;;  %v1157_v50 = vld [vmem:[%s1724_s3] sm:$0xff]  ;;  %v31_v18 = vld [vmem:[%s1725_s0 + $0x18] sm:$0xff] }
  0x28   :  { %492 = vmatpush.bf16.msrb.mxu2 %v1003_v54  ;;  %505 = vmatpush.bf16.msrb.mxu3 %v1007_v55  ;;  %v951_v24 = vor.u32 %v1131_v21, %v950_v19  ;;  %v28_v19 = vld [vmem:[%s1725_s0] sm:$0xff]  ;;  %v1097_v21 = vld [vmem:[%s1723_s5 + $0x138] sm:$0xf0]  ;;  %v35_v23 = vmul.f32 0.7, %v31_v18  ;;  %v30_v27 = vld [vmem:[%s1725_s0 + $0x10] sm:$0xff] }
  0x29   :  { %v1081_v26 = vld [vmem:[%s1723_s5 + $0x118] sm:$0xf0]  ;;  %v29_v30 = vld [vmem:[%s1725_s0 + $0x8] sm:$0xff]  ;;  %s1203_s0 = smov 126  }
  0x2b   :  { %277 = vmatpush.bf16.msrb.mxu0 %v1121_v33  ;;  %480 = vmatpush.bf16.msrb.mxu1 %v983_v62  ;;  %v1127_v33 = vld [vmem:[%s1723_s5 + $0xc] sm:$0xf0]  ;;  %v540_v62 = vld [vmem:[%s1722_s4 + $0x8] sm:$0xf] }
  0x2c   :  { %493 = vmatpush.bf16.msrb.mxu2 %v987_v2  ;;  %506 = vmatpush.bf16.msrb.mxu3 %v991_v3  ;;  %v935_v35 = vor.u32 %v1127_v33, %v934_v32  ;;  %v1071_v2 = vld [vmem:[%s1723_s5 + $0x100] sm:$0xf]  ;;  %v1161_v3 = vld [vmem:[%s1723_s5 + $0x10c] sm:$0xf0] }
  0x2d   :  { %v1072_v5 = vor.u32 %v1161_v3, %v1071_v2 }
  0x2e   :  { %931 = vmatmul.msk.bf16.vlgmr.msrb.gmra.mxu0 %vm145_vm1, %v227_v42  ;;  %v944_v42 = vld [vmem:[%s1723_s5 + $0x18] sm:$0xf0] }
  0x2f   :  { %515 = vmatpush.bf16.msra.mxu0 %v1059_v36  ;;  %481 = vmatpush.bf16.msrb.mxu1 %v967_v11  ;;  %v936_v36 = vld [vmem:[%s1723_s5 + $0x10] sm:$0xf0]  ;;  %v1096_v11 = vor.u32 %v1166_v9, %v1095_v8 }
  0x30   :  { %494 = vmatpush.bf16.msrb.mxu2 %v971_v15  ;;  %507 = vmatpush.bf16.msrb.mxu3 %v975_v16  ;;  %v939_v39 = vor.u32 %v1125_v34, %v936_v36  ;;  %v1076_v15 = vor.u32 %v1159_v12, %v1073_v13  ;;  %v1162_v16 = vld [vmem:[%s1723_s5 + $0x114] sm:$0xf0]  ;;  %v34_v34 = vmul.f32 0.7, %v30_v27 }
  0x31   :  { %v1080_v17 = vor.u32 %v1162_v16, %v1079_v14 }
  0x33   :  { %516 = vmatpush.bf16.msra.mxu0 %v1043_v43  ;;  %482 = vmatpush.bf16.msrb.mxu1 %v951_v24  ;;  %v947_v43 = vor.u32 %v1126_v41, %v944_v42  ;;  %v32_v24 = vmul.f32 0.7, %v28_v19 }
  0x34   :  { %495 = vmatpush.bf16.msrb.mxu2 %v955_v25  ;;  %508 = vmatpush.bf16.msrb.mxu3 %v959_v29  ;;  %v1160_v25 = vld [vmem:[%s1723_s5 + $0x10c] sm:$0xf]  ;;  %v1202_v29 = vmov 2  }
  0x35   :  { %v1084_v28 = vor.u32 %v1160_v25, %v1081_v26  ;;  %1176 = vset.pattern.permute.xlu1 %v1202_v29 }
  0x36   :  { %692 = vperm.xlu1 %1176, %v1259_v6  }
  0x37   :  { %517 = vmatpush.bf16.msra.mxu0 %v1027_v46  ;;  %483 = vmatpush.bf16.msrb.mxu1 %v935_v35  ;;  %v558_v46 = vpack.c.b16 %v555_v45, %v555_v45  ;;  %v33_v35 = vmul.f32 0.7, %v29_v30 }
  0x38   :  { %496 = vmatpush.bf16.msrb.mxu2 %v939_v39  ;;  %509 = vmatpush.bf16.msrb.mxu3 %v943_v40 }
  0x39   :  { %v567_v47 = vsel %vm565_vm2, %v558_v46, 0 }
  0x3b   :  { %518 = vmatpush.bf16.msra.mxu0 %v1011_v58  ;;  %574 = vmatpush.bf16.msra.mxu1 %v567_v47 }
  0x3c   :  { %641 = vmatpush.bf16.msra.mxu2 %v1088_v1 }
  0x3f   :  { %519 = vmatpush.bf16.msra.mxu0 %v995_v7  ;;  %575 = vmatpush.bf16.msra.mxu1 %v1158_v48  ;;  %v1089_v7 = vld [vmem:[%s1723_s5 + $0x130] sm:$0xf0] }
  0x40   :  { %v1092_v10 = vor.u32 %v1163_v4, %v1089_v7  ;;  %642 = vmatpush.bf16.msra.mxu2 %v1072_v5 }
  0x42   :  { %654 = vmatpush.bf16.msra.mxu3 %v1092_v10 }
  0x43   :  { %520 = vmatpush.bf16.msra.mxu0 %v979_v20  ;;  %576 = vmatpush.bf16.msra.mxu1 %v1157_v50  ;;  %v1164_v20 = vld [vmem:[%s1723_s5 + $0x12c] sm:$0xf]  ;;  %s1205_s5 = smov 3  }
  0x44   :  { %v1100_v22 = vor.u32 %v1164_v20, %v1097_v21 }
  0x46   :  { %655 = vmatpush.bf16.msra.mxu3 %v1076_v15 }
  0x47   :  { %521 = vmatpush.bf16.msra.mxu0 %v963_v31 }
  0x4b   :  { %522 = vmatpush.bf16.msra.mxu0 %v947_v43 }
  0x76   :  { %v221_v33 = vpop.permute.xlu0 %220 }
  0x97   :  { %v171_v51 = vpop.f32.mrf.mxu0  ;;  %v1594_v53 = vpop.f32.mrf.mxu1 }
  0x98   :  { %v214_v32 = vadd.f32 %v171_v51, %v32_v24  ;;  %v215_v40 = vadd.f32 %v1594_v53, %v33_v35 }
  0x9a   :  { %v223_v37 = vadd.f32 %v221_v33, %v214_v32  ;;  %v224_v45 = vadd.f32 %v221_v33, %v215_v40 }
  0x9f   :  { %v173_v52 = vpop.f32.mrf.mxu0  ;;  %v186_v56 = vpop.f32.mrf.mxu1 }
  0xa0   :  { %v1596_v54 = vpop.f32.mrf.mxu2  ;;  %v210_v58 = vpop.f32.mrf.mxu3 }
  0xa1   :  { %v217_v31 = vadd.f32 %v210_v58, %v35_v23  ;;  %v216_v38 = vadd.f32 %v1596_v54, %v34_v34  ;;  %v534_v54 = vpop.permute.xlu0 %533 }
  0xa3   :  { %v226_v36 = vadd.f32 %v221_v33, %v217_v31  ;;  %v225_v44 = vadd.f32 %v221_v33, %v216_v38 }
  0xa8   :  { %v199_v59 = vpop.f32.mrf.mxu2  ;;  %v212_v61 = vpop.f32.mrf.mxu3 }
  0xab   :  { %v279_v55 = vpop.f32.mrf.mxu0 }
  0xac   :  { %v315_v57 = vpack.c.bf16 %v279_v55, %v279_v55 }
  0xae   :  { %484 = vmatmul.bf16.vlgmr.msrb.gmra.mxu1 %v315_v57  ;;  %497 = vmatmul.bf16.vlgmr.msrb.gmra.mxu2 %v315_v57 }
  0xaf   :  { %510 = vmatmul.bf16.vlgmr.msrb.gmra.mxu3 %v315_v57  ;;  %523 = vmatmul.bf16.vlgmr.msra.gmra.mxu0 %v315_v57 }
  0xb0   :  { %667 = vmatpush.bf16.msrb.mxu1 %v1096_v11  ;;  %680 = vmatpush.bf16.msrb.mxu2 %v1100_v22 }
  0xb3   :  { %v281_v60 = vpop.f32.mrf.mxu0 }
  0xb4   :  { %668 = vmatpush.bf16.msrb.mxu1 %v1080_v17  ;;  %681 = vmatpush.bf16.msrb.mxu2 %v1084_v28  ;;  %v693_v60 = vpop.permute.xlu1 %692 }
  0xbe   :  { %1068 = vmatmul.msk.bf16.vlgmr.msra.gmra.mxu1 %vm561_vm3, %v540_v62 }
 0x12b   :  { %v485_v39 = vpop.f32.mrf.mxu1 }
 0x12c   :  { %v528_v41 = vadd.f32 %v485_v39, %v223_v37  ;;  %v524_v42 = vpop.f32.mrf.mxu0 }
 0x12d   :  { %v531_v43 = vadd.f32 %v524_v42, %v226_v36 }
 0x12e   :  { %v536_v63 = vadd.f32 %v534_v54, %v528_v41 }
 0x12f   :  { %v539_v20 = vadd.f32 %v534_v54, %v531_v43 }
 0x131   :  { %v498_v46 = vpop.f32.mrf.mxu2 }
 0x132   :  { %v529_v47 = vadd.f32 %v498_v46, %v224_v45  ;;  %v511_v48 = vpop.f32.mrf.mxu3 }
 0x133   :  { %v530_v49 = vadd.f32 %v511_v48, %v225_v44  ;;  %v487_v50 = vpop.f32.mrf.mxu1 }
 0x134   :  { %v526_v51 = vpop.f32.mrf.mxu0  ;;  %v537_v0 = vadd.f32 %v534_v54, %v529_v47 }
 0x135   :  { %v538_v58 = vadd.f32 %v534_v54, %v530_v49 }
 0x139   :  { %v500_v52 = vpop.f32.mrf.mxu2 }
 0x13a   :  { %v513_v55 = vpop.f32.mrf.mxu3 }
 0x13b   :  { %v578_v56 = vpop.f32.mrf.mxu1 }
 0x13c   :  { %v590_v57 = vpack.c.bf16 %v578_v56, %v578_v56 }
 0x13e   :  { %1101 = vmatmul.msk.bf16.vlgmr.msra.gmra.mxu2 %vm631_vm4, %v590_v57  ;;  %1102 = vmatmul.msk.bf16.vlgmr.msra.gmra.mxu3 %vm631_vm4, %v590_v57 }
 0x13f   :  { %1103 = vmatmul.msk.bf16.vlgmr.msrb.gmra.mxu1 %vm631_vm4, %v590_v57 }
 0x143   :  { %v580_v53 = vpop.f32.mrf.mxu1 }
 0x14e   :  { %1104 = vmatmul.msk.bf16.vlgmr.msrb.gmra.mxu2 %vm631_vm4, %v590_v57 }
 0x1bc   :  { %v670_v59 = vpop.f32.mrf.mxu1 }
 0x1bd   :  { %v689_v61 = vadd.f32 %v670_v59, %v538_v58 }
 0x1bf   :  { %v1664_v62 = vadd.f32 %v693_v60, %v689_v61 }
 0x1c1   :  { %v644_v1 = vpop.f32.mrf.mxu2  ;;  %v657_v2 = vpop.f32.mrf.mxu3  ;;  %v701_v3 = vand.u32 2147483647, %v1664_v62  ;;  %vm749_vm11 = vcmp.gt.f32.partialorder %v1664_v62, 20.0 }
 0x1c2   :  { %v687_v4 = vadd.f32 %v644_v1, %v536_v63  ;;  %v688_v5 = vadd.f32 %v657_v2, %v537_v0 }
 0x1c3   :  { %v705_v10 = vsub.f32 0.0, %v701_v3 }
 0x1c4   :  { %v1667_v7 = vadd.f32 %v693_v60, %v687_v4  ;;  %v1669_v8 = vadd.f32 %v693_v60, %v688_v5  ;;  %v672_v9 = vpop.f32.mrf.mxu1 }
 0x1c5   :  { %v711_v17 = vmul.f32 1.442695, %v705_v10 }
 0x1c6   :  { %v699_v11 = vand.u32 2147483647, %v1667_v7  ;;  %v700_v12 = vand.u32 2147483647, %v1669_v8  ;;  %v751_v50 = vmax.f32 %v1667_v7, 0.0  ;;  %v752_v51 = vmax.f32 %v1669_v8, 0.0 }
 0x1c7   :  { %vm747_vm8 = vcmp.gt.f32.partialorder %v1667_v7, 20.0  ;;  %vm748_vm9 = vcmp.gt.f32.partialorder %v1669_v8, 20.0 }
 0x1c8   :  { %v703_v13 = vsub.f32 0.0, %v699_v11  ;;  %v704_v14 = vsub.f32 0.0, %v700_v12 }
 0x1c9   :  { %v646_v15 = vpop.f32.mrf.mxu2  ;;  %v659_v16 = vpop.f32.mrf.mxu3 }
 0x1ca   :  { %v707_v18 = vmul.f32 1.442695, %v703_v13  ;;  %v709_v19 = vmul.f32 1.442695, %v704_v14 }
 0x1cc   :  { %1180 = vpow2.f32 %v707_v18 }
 0x1cd   :  { %1182 = vpow2.f32 %v709_v19 }
 0x1ce   :  { %1184 = vpow2.f32 %v711_v17 }
 0x1d1   :  { %v683_v21 = vpop.f32.mrf.mxu2 }
 0x1d2   :  { %v1181_v22 = vpop.eup %1180  ;;  %v690_v23 = vadd.f32 %v683_v21, %v539_v20 }
 0x1d3   :  { %v1183_v24 = vpop.eup %1182  ;;  %v719_v25 = vadd.f32 1.0, %v1181_v22  ;;  %v731_v32 = vmul.f32 0.5, %v1181_v22  ;;  %vm715_vm5 = vcmp.gt.f32.partialorder %v1181_v22, 0.0001 }
 0x1d4   :  { %v1185_v26 = vpop.eup %1184  ;;  %v698_v27 = vadd.f32 %v693_v60, %v690_v23  ;;  %v720_v28 = vadd.f32 1.0, %v1183_v24  ;;  %v732_v33 = vmul.f32 0.5, %v1183_v24  ;;  %vm716_vm6 = vcmp.gt.f32.partialorder %v1183_v24, 0.0001 }
 0x1d5   :  { %1186 = vlog2.f32 %v719_v25  ;;  %v721_v30 = vadd.f32 1.0, %v1185_v26  ;;  %v735_v38 = vsub.f32 1.0, %v731_v32  ;;  %v733_v42 = vmul.f32 0.5, %v1185_v26 }
 0x1d6   :  { %v702_v29 = vand.u32 2147483647, %v698_v27  ;;  %1188 = vlog2.f32 %v720_v28  ;;  %v736_v39 = vsub.f32 1.0, %v732_v33  ;;  %vm717_vm7 = vcmp.gt.f32.partialorder %v1185_v26, 0.0001 }
 0x1d7   :  { %1190 = vlog2.f32 %v721_v30  ;;  %v739_v43 = vmul.f32 %v1181_v22, %v735_v38  ;;  %v737_v47 = vsub.f32 1.0, %v733_v42  ;;  %v753_v60 = vmax.f32 %v1664_v62, 0.0 }
 0x1d8   :  { %v706_v31 = vsub.f32 0.0, %v702_v29  ;;  %v740_v44 = vmul.f32 %v1183_v24, %v736_v39  ;;  %v754_v5 = vmax.f32 %v698_v27, 0.0  ;;  %vm750_vm12 = vcmp.gt.f32.partialorder %v698_v27, 20.0 }
 0x1d9   :  { %v685_v34 = vpop.f32.mrf.mxu2  ;;  %v741_v54 = vmul.f32 %v1185_v26, %v737_v47  ;;  %v794_v33 = vmul.f32 %v1259_v6, %v1259_v6 }
 0x1da   :  { %v713_v35 = vmul.f32 1.442695, %v706_v31 }
 0x1db   :  { %v1187_v36 = vpop.eup %1186 }
 0x1dc   :  { %v1189_v37 = vpop.eup %1188  ;;  %1192 = vpow2.f32 %v713_v35  ;;  %v724_v40 = vmul.f32 0.6931472, %v1187_v36  ;;  %v1204_v35 = vmov 3  }
 0x1dd   :  { %v726_v41 = vmul.f32 0.6931472, %v1189_v37  ;;  %v1191_v45 = vpop.eup %1190  ;;  %1177 = vset.pattern.permute.xlu0 %v1204_v35 }
 0x1de   :  { %v743_v48 = vsel %vm715_vm5, %v724_v40, %v739_v43  ;;  %v728_v55 = vmul.f32 0.6931472, %v1191_v45 }
 0x1df   :  { %v744_v49 = vsel %vm716_vm6, %v726_v41, %v740_v44  ;;  %v755_v57 = vadd.f32 %v751_v50, %v743_v48 }
 0x1e0   :  { %v756_v53 = vadd.f32 %v752_v51, %v744_v49  ;;  %v745_v59 = vsel %vm717_vm7, %v728_v55, %v741_v54  ;;  %v1206_v55 = vmov 6  }
 0x1e1   :  { %v1679_v61 = vsel %vm747_vm8, %v1667_v7, %v755_v57  ;;  %v757_v1 = vadd.f32 %v753_v60, %v745_v59  ;;  %1178 = vset.pattern.permute.xlu2 %v1206_v55 }
 0x1e2   :  { %v1193_v46 = vpop.eup %1192  ;;  %v1682_v63 = vsel %vm748_vm9, %v1669_v8, %v756_v53 }
 0x1e3   :  { %v722_v52 = vadd.f32 1.0, %v1193_v46  ;;  %v734_v56 = vmul.f32 0.5, %v1193_v46  ;;  %v763_v4 = vadd.f32 %v1682_v63, %v1679_v61  ;;  %vm718_vm10 = vcmp.gt.f32.partialorder %v1193_v46, 0.0001 }
 0x1e4   :  { %v1688_v11 = vsel %vm749_vm11, %v1664_v62, %v757_v1 }
 0x1e5   :  { %1194 = vlog2.f32 %v722_v52  ;;  %v738_v58 = vsub.f32 1.0, %v734_v56  ;;  %v764_v7 = vadd.f32 %v763_v4, %v1688_v11 }
 0x1e7   :  { %v742_v3 = vmul.f32 %v1193_v46, %v738_v58 }
 0x1eb   :  { %v1195_v0 = vpop.eup %1194 }
 0x1ec   :  { %v730_v2 = vmul.f32 0.6931472, %v1195_v0 }
 0x1ee   :  { %v746_v9 = vsel %vm718_vm10, %v730_v2, %v742_v3 }
 0x1ef   :  { %v758_v10 = vadd.f32 %v754_v5, %v746_v9 }
 0x1f1   :  { %v1691_v8 = vsel %vm750_vm12, %v698_v27, %v758_v10 }
 0x1f2   :  { %v765_v12 = vadd.f32 %v764_v7, %v1691_v8 }
 0x1f4   :  { %766 = vadd.xlane.f32.xlu1 %v765_v12 }
 0x267   :  { %v767_v13 = vpop.xlane.xlu1 %766 }
 0x268   :  { %v768_v14 = vmul.f32 0.001953125, %v767_v13 }
 0x26a   :  { %v769_v15 = vsub.f32 %v1679_v61, %v768_v14  ;;  %v770_v16 = vsub.f32 %v1682_v63, %v768_v14  ;;  %v771_v17 = vsub.f32 %v1688_v11, %v768_v14  ;;  %v772_v18 = vsub.f32 %v1691_v8, %v768_v14 }
 0x26c   :  { %v773_v62 = vmul.f32 %v769_v15, %v769_v15  ;;  %v774_v19 = vmul.f32 %v770_v16, %v770_v16  ;;  %v775_v20 = vmul.f32 %v771_v17, %v771_v17  ;;  %v776_v22 = vmul.f32 %v772_v18, %v772_v18 }
 0x26e   :  { %v777_v21 = vadd.f32 %v774_v19, %v773_v62 }
 0x270   :  { %v778_v23 = vadd.f32 %v777_v21, %v775_v20 }
 0x272   :  { %v779_v24 = vadd.f32 %v778_v23, %v776_v22 }
 0x274   :  { %780 = vadd.xlane.f32.xlu2 %v779_v24 }
 0x28c   :  { %798 = vrot.lane.b32.xlu2 %v1259_v6, %s1203_s0 }
 0x2e7   :  { %v781_v25 = vpop.xlane.xlu2 %780 }
 0x2e8   :  { %v782_v26 = vmul.f32 0.001953125, %v781_v25 }
 0x2ea   :  { %v783_v27 = vadd.f32 1e-05, %v782_v26  ;;  %v795_v37 = vmul.f32 %v794_v33, %v782_v26 }
 0x2ec   :  { %1196 = vrsqrt.f32 %v783_v27  ;;  %vm790_vm14 = vweird.f32 %v783_v27 }
 0x2ef   :  { %v799_v44 = vpop.permute.xlu2 %798 }
 0x2f0   :  { %v801_v46 = vmul.f32 %v799_v44, %v1259_v6 }
 0x2f2   :  { %v1197_v28 = vpop.eup %1196 }
 0x2f3   :  { %v785_v29 = vmul.f32 %v1197_v28, %v783_v27  ;;  %vm791_vm13 = vweird.f32 %v1197_v28 }
 0x2f4   :  { %vm792_vm15 = vmor %vm790_vm14, %vm791_vm13 }
 0x2f5   :  { %v786_v30 = vmul.f32 %v1197_v28, %v785_v29 }
 0x2f7   :  { %v787_v31 = vmul.f32 0.5, %v786_v30 }
 0x2f9   :  { %v788_v32 = vsub.f32 1.5, %v787_v31 }
 0x2fb   :  { %v789_v34 = vmul.f32 %v1197_v28, %v788_v32 }
 0x2fd   :  { %v793_v36 = vsel %vm792_vm15, %v1197_v28, %v789_v34 }
 0x2fe   :  { %v796_v38 = vmul.f32 %v793_v36, %v793_v36  ;;  %v802_v49 = vmul.f32 %v801_v46, %v793_v36 }
 0x300   :  { %v797_v39 = vmul.f32 %v796_v38, %v795_v37 }
 0x302   :  { %v803_v40 = vadd.f32 1e-05, %v797_v39 }
 0x304   :  { %1198 = vrsqrt.f32 %v803_v40  ;;  %vm810_vm1 = vweird.f32 %v803_v40 }
 0x30a   :  { %v1199_v41 = vpop.eup %1198 }
 0x30b   :  { %v805_v42 = vmul.f32 %v1199_v41, %v803_v40  ;;  %vm811_vm0 = vweird.f32 %v1199_v41 }
 0x30c   :  { %vm812_vm2 = vmor %vm810_vm1, %vm811_vm0 }
 0x30d   :  { %v806_v43 = vmul.f32 %v1199_v41, %v805_v42 }
 0x30f   :  { %v807_v45 = vmul.f32 0.5, %v806_v43 }
 0x311   :  { %v808_v47 = vsub.f32 1.5, %v807_v45 }
 0x313   :  { %v809_v48 = vmul.f32 %v1199_v41, %v808_v47 }
 0x315   :  { %v813_v50 = vsel %vm812_vm2, %v1199_v41, %v809_v48 }
 0x316   :  { %v814_v51 = vmul.f32 %v813_v50, %v802_v49 }
 0x318   :  { %v815_v52 = vmul.f32 %v814_v51, %v768_v14 }
 0x31a   :  { %817 = vrot.lane.b32.xlu0 %v815_v52, %s1205_s5 }
 0x322   :  { %823 = vperm.xlu0 %1177, %v814_v51  }
 0x32a   :  { %1179 = vset.pattern.permute.xlu0 %v1206_v55 }
 0x38c   :  { %v818_v56 = vpop.permute.xlu0 %817 }
 0x38d   :  { %v820_v57 = vsub.f32 %v1259_v6, %v818_v56 }
 0x38f   :  { %832 = vperm.xlu2 %1178, %v820_v57  }
 0x394   :  { %v824_v53 = vpop.permute.xlu0 %823 }
 0x395   :  { %v826_v54 = vmul.f32 %v824_v53, %v1679_v61  ;;  %v827_v58 = vmul.f32 %v824_v53, %v1682_v63  ;;  %v828_v59 = vmul.f32 %v824_v53, %v1688_v11  ;;  %v829_v60 = vmul.f32 %v824_v53, %v1691_v8 }
 0x3e9   :  { %v833_v0 = vpop.permute.xlu2 %832 }
 0x3ea   :  { %v835_v1 = vadd.f32 %v833_v0, %v826_v54  ;;  %v836_v2 = vadd.f32 %v833_v0, %v827_v58  ;;  %v837_v3 = vadd.f32 %v833_v0, %v828_v59  ;;  %v838_v4 = vadd.f32 %v833_v0, %v829_v60 }
 0x3ec   :  { %839 = vst [vmem:[%s1726_s7] sm:$0xff] %v835_v1 }
 0x3ed   :  { %840 = vst [vmem:[%s1726_s7 + $0x8] sm:$0xff] %v836_v2 }
 0x3ee   :  { %841 = vst [vmem:[%s1726_s7 + $0x10] sm:$0xff] %v837_v3 }
 0x3ef   :  { %842 = vst [vmem:[%s1726_s7 + $0x18] sm:$0xff] %v838_v4 }

</bundles_post_ra>
